<compile_context>
chip_gen: v5e
topology: v5e:2x2
jax: 0.10.0
libtpu: 0.0.40
codegen_flags: <defaults>
</compile_context>

<pallas_src>
import jax
import jax.numpy as jnp
import numpy as np
from jax.experimental import pallas as pl
from jax.experimental.pallas import tpu as pltpu

# ---- problem sizes (small, consistent with the module) ----
B = 8    # batch (num samples)
D = 32   # latent dim
P = 16   # past / conditioning dim (passthrough)
H = 32   # hidden width of coupling-net MLP
K = 2    # number of coupling bijections

OUT_W = 8                           # packed output lanes (0=full_lp, 1=dist_lp, 2=log_det)
_LOG_2PI = float(np.log(2.0 * np.pi))


def _round_up(v, m):
    return ((v + m - 1) // m) * m


def _flow_kernel(x_ref, past_ref, w1x_ref, w1p_ref, b1_ref, w2_ref, b2_ref, omm_ref,
                 out_ref):
    """K fused affine-coupling layers + base-dist log-prob, all in VMEM.

    x_ref    : (TB, D)      f32  batch tile of the latent
    past_ref : (TB, P)      f32  conditioning features
    w1x_ref  : (K, D, H)    bf16 mask-folded conditioner weights (m * W1x)
    w1p_ref  : (K, P, H)    bf16 conditioner weights on `past`
    b1_ref   : (K, 1, H)    f32  conditioner bias
    w2_ref   : (K, H, 2D)   bf16 [Ws | (1-m)*Wt]
    b2_ref   : (K, 1, 2D)   f32  [bs | (1-m)*bt]
    omm_ref  : (K, 1, D)    f32  (1 - mask) per layer
    out_ref  : (TB, 8)      f32  lane 0 = full_lp, 1 = dist_lp, 2 = log_det
    """
    tb, d = x_ref.shape
    n_layers = w1x_ref.shape[0]

    x = x_ref[...]                                   # (TB, D) f32 coupling state
    past_b = past_ref[...].astype(jnp.bfloat16)      # cast once, reused for all layers

    # Loop-invariant conditioner contribution from `past` (+ bias), hoisted out of
    # the serial per-layer chain.
    past_terms = [
        jnp.dot(past_b, w1p_ref[k], preferred_element_type=jnp.float32) + b1_ref[k]
        for k in range(n_layers)
    ]

    s_acc = jnp.zeros((tb, d), jnp.float32)

    # n_layers is a static Python int -> unrolled at trace time.
    for k in range(n_layers):
        # conditioner:  hid = tanh( x @ (m*W1x)  +  [past@W1p + b1] )
        hid = jnp.tanh(
            jnp.dot(x.astype(jnp.bfloat16), w1x_ref[k],
                    preferred_element_type=jnp.float32)
            + past_terms[k])                                      # (TB, H) f32

        # fused scale/translate head:  st = hid @ [Ws | (1-m)Wt] + [bs | (1-m)bt]
        st = jnp.dot(hid.astype(jnp.bfloat16), w2_ref[k],
                     preferred_element_type=jnp.float32) + b2_ref[k]   # (TB, 2D) f32

        s = omm_ref[k] * jnp.tanh(st[:, :d])   # masked log-scale: 0 on pass-through dims
        t = st[:, d:]                          # (1-m) already folded into Wt/bt

        # affine coupling: exp(s)=1 and t=0 on pass-through dims -> identity there
        x = x * jnp.exp(s) + t
        s_acc = s_acc + s

    log_det = jnp.sum(s_acc, axis=-1, keepdims=True)                          # (TB, 1)
    dist_lp = jnp.sum(-0.5 * x * x - 0.5 * _LOG_2PI, axis=-1, keepdims=True)  # (TB, 1)
    full_lp = dist_lp + log_det

    lane = jax.lax.broadcasted_iota(jnp.int32, (tb, out_ref.shape[1]), 1)
    out_ref[...] = jnp.where(
        lane == 0, full_lp,
        jnp.where(lane == 1, dist_lp,
                  jnp.where(lane == 2, log_det, 0.0)))


@jax.jit
def flow_log_prob(x, past, packed_params):
    """Pallas wrapper: returns (full_log_prob, dist_log_prob, log_det), each (B,)."""
    w1x, w1p, b1, w2, b2, omm = packed_params
    x = x.astype(jnp.float32)
    past = past.astype(jnp.float32)
    b, d = x.shape
    p = past.shape[1]
    n_layers, _, h = w1x.shape

    # ---- batch tiling ----------------------------------------------------------
    # Big tiles (per-grid-step overhead ~0.35 us dominates small tiles), but keep
    # >= 2 grid steps once b >= 256 so the "parallel" axis shards across the two
    # TensorCores on v7x.  Pad the batch instead of asserting divisibility.
    if b < 256:
        tb = _round_up(max(b, 1), 8)
    else:
        tb = min(2048, _round_up((b + 1) // 2, 8))
    bp = _round_up(max(b, 1), tb)
    if bp != b:
        x = jnp.pad(x, ((0, bp - b), (0, 0)))
        past = jnp.pad(past, ((0, bp - b), (0, 0)))
    grid = (bp // tb,)

    # ---- advisory cost estimate ------------------------------------------------
    flops = bp * n_layers * (2 * d * h + 2 * h * 2 * d + 2 * p * h)
    transcendentals = bp * n_layers * (h + 2 * d)
    weight_bytes = (n_layers * (d * h + p * h + h * 2 * d) * 2
                    + n_layers * (h + 2 * d + d) * 4)
    bytes_accessed = bp * (4 * d + 4 * p + 4 * OUT_W) + weight_bytes
    cost = pl.CostEstimate(flops=flops, transcendentals=transcendentals,
                           bytes_accessed=bytes_accessed)

    out = pl.pallas_call(
        _flow_kernel,
        out_shape=jax.ShapeDtypeStruct((bp, OUT_W), jnp.float32),
        grid=grid,
        in_specs=[
            pl.BlockSpec((tb, d), lambda i: (i, 0)),
            pl.BlockSpec((tb, p), lambda i: (i, 0)),
            # weights: full-array blocks, same block every step -> VMEM-resident
            pl.BlockSpec(w1x.shape, lambda i: (0, 0, 0)),
            pl.BlockSpec(w1p.shape, lambda i: (0, 0, 0)),
            pl.BlockSpec(b1.shape, lambda i: (0, 0, 0)),
            pl.BlockSpec(w2.shape, lambda i: (0, 0, 0)),
            pl.BlockSpec(b2.shape, lambda i: (0, 0, 0)),
            pl.BlockSpec(omm.shape, lambda i: (0, 0, 0)),
        ],
        out_specs=pl.BlockSpec((tb, OUT_W), lambda i: (i, 0)),
        compiler_params=pltpu.CompilerParams(
            dimension_semantics=("parallel",)),
        cost_estimate=cost,
    )(x, past, w1x, w1p, b1, w2, b2, omm)

    return out[:b, 0], out[:b, 1], out[:b, 2]


def _init_raw_params(key):
    """Deterministic synthetic weights for K coupling layers (unpacked / unfused)."""
    keys = jax.random.split(key, 8)
    scale = 0.1
    w1x = scale * jax.random.normal(keys[0], (K, D, H), jnp.float32)
    w1p = scale * jax.random.normal(keys[1], (K, P, H), jnp.float32)
    b1 = scale * jax.random.normal(keys[2], (K, 1, H), jnp.float32)
    ws = scale * jax.random.normal(keys[3], (K, H, D), jnp.float32)
    bs = scale * jax.random.normal(keys[4], (K, 1, D), jnp.float32)
    wt = scale * jax.random.normal(keys[5], (K, H, D), jnp.float32)
    bt = scale * jax.random.normal(keys[6], (K, 1, D), jnp.float32)
    # alternating half masks, shape (K, 1, D)
    base = (jnp.arange(D) < (D // 2)).astype(jnp.float32)
    masks = jnp.stack([base if k % 2 == 0 else 1.0 - base for k in range(K)])
    masks = masks.reshape(K, 1, D)
    return (w1x, w1p, b1, ws, bs, wt, bt, masks)


def _pack_params(raw):
    """Fold masks into the linear terms and pack into 6 kernel operands."""
    w1x, w1p, b1, ws, bs, wt, bt, masks = raw
    omm = 1.0 - masks                                             # (K, 1, D)

    # conditioner: rows the conditioner may not see (m==0) are zeroed, so
    # (x*m) @ W1x == x @ W1x_folded exactly.
    w1x_f = w1x * jnp.transpose(masks, (0, 2, 1))                 # (K, D, H)

    # head: fold (1-m) into Wt/bt (linear, exact); Ws/bs stay unmasked since the
    # tanh on s is nonlinear and keeps its explicit (1-m) in the kernel.
    w2 = jnp.concatenate([ws, wt * omm], axis=2)                  # (K, H, 2D)
    b2 = jnp.concatenate([bs, bt * omm], axis=2)                  # (K, 1, 2D)

    return (w1x_f.astype(jnp.bfloat16),
            w1p.astype(jnp.bfloat16),
            b1.astype(jnp.float32),
            w2.astype(jnp.bfloat16),
            b2.astype(jnp.float32),
            omm.astype(jnp.float32))


def _reference_log_prob(x, past, raw_params, compute_dtype=jnp.bfloat16):
    """Pure-JAX reference mirroring the PyTorch semantics (unfused, unfolded).

    `compute_dtype` controls the matmul-operand precision so the reference can
    reproduce the kernel's bf16-operand / f32-accumulate numerics (biases and
    elementwise math stay in f32, like the kernel).
    """
    w1x, w1p, b1, ws, bs, wt, bt, masks = raw_params
    cd = compute_dtype
    f32 = jnp.float32
    x = x.astype(f32)
    past = past.astype(f32)
    log_det = jnp.zeros((x.shape[0],), f32)
    for k in range(K):
        m = masks[k]
        omm = 1.0 - m
        xm = x * m
        hid = jnp.tanh(
            jnp.dot(xm.astype(cd), w1x[k].astype(cd), preferred_element_type=f32)
            + jnp.dot(past.astype(cd), w1p[k].astype(cd), preferred_element_type=f32)
            + b1[k])
        s = jnp.tanh(
            jnp.dot(hid.astype(cd), ws[k].astype(cd), preferred_element_type=f32)
            + bs[k]) * omm
        t = (jnp.dot(hid.astype(cd), wt[k].astype(cd), preferred_element_type=f32)
             + bt[k]) * omm
        x = xm + omm * (x * jnp.exp(s) + t)
        log_det = log_det + jnp.sum(s, axis=-1)
    dist_lp = jnp.sum(-0.5 * x * x - 0.5 * _LOG_2PI, axis=-1)
    return dist_lp + log_det, dist_lp, log_det


if __name__ == "__main__":
    key = jax.random.PRNGKey(0)
    k_x, k_p, k_w = jax.random.split(key, 3)
    x = jax.random.normal(k_x, (B, D), jnp.float32)
    past = jax.random.normal(k_p, (B, P), jnp.float32)

    raw_params = _init_raw_params(k_w)
    packed_params = _pack_params(raw_params)

    full_lp, dist_lp, log_det = flow_log_prob(x, past, packed_params)
    jax.block_until_ready((full_lp, dist_lp, log_det))

    # numerics-matched reference: same bf16 matmul operands, f32 accumulation / bias /
    # elementwise math.
    ref_full, ref_dist, ref_ld = _reference_log_prob(x, past, raw_params, jnp.bfloat16)
    np.testing.assert_allclose(np.asarray(full_lp), np.asarray(ref_full), rtol=5e-3, atol=5e-3)
    np.testing.assert_allclose(np.asarray(dist_lp), np.asarray(ref_dist), rtol=5e-3, atol=5e-3)
    np.testing.assert_allclose(np.asarray(log_det), np.asarray(ref_ld), rtol=5e-3, atol=5e-3)

    # structural sanity check against full-f32 semantics (bounds bf16 quantization)
    f32_full, _, _ = _reference_log_prob(x, past, raw_params, jnp.float32)
    np.testing.assert_allclose(np.asarray(full_lp), np.asarray(f32_full), rtol=1e-2, atol=0.3)

    print("KERNEL_OK")
</pallas_src>

<mosaic_0001>
module attributes {stable_mosaic.version = 11 : i64} {
  func.func @_flow_kernel(%arg0: i32, %arg1: memref<8x32xf32, #tpu.memory_space<vmem>>, %arg2: memref<8x16xf32, #tpu.memory_space<vmem>>, %arg3: memref<2x32x32xbf16, #tpu.memory_space<vmem>>, %arg4: memref<2x16x32xbf16, #tpu.memory_space<vmem>>, %arg5: memref<2x1x32xf32, #tpu.memory_space<vmem>>, %arg6: memref<2x32x64xbf16, #tpu.memory_space<vmem>>, %arg7: memref<2x1x64xf32, #tpu.memory_space<vmem>>, %arg8: memref<2x1x32xf32, #tpu.memory_space<vmem>>, %arg9: memref<8x8xf32, #tpu.memory_space<vmem>>) attributes {dimension_semantics = [#tpu.dimension_semantics<parallel>], iteration_bounds = array<i64: 1>, scalar_prefetch = 0 : i64, scratch_operands = 0 : i64, tpu.core_type = #tpu.core_type<tc>, window_params = [{transform_indices = @transform_0, window_bounds = array<i64: 8, 32>}, {transform_indices = @transform_1, window_bounds = array<i64: 8, 16>}, {pipeline_mode = #tpu.pipeline_mode<synchronous>, transform_indices = @transform_2, window_bounds = array<i64: 2, 32, 32>}, {pipeline_mode = #tpu.pipeline_mode<synchronous>, transform_indices = @transform_3, window_bounds = array<i64: 2, 16, 32>}, {pipeline_mode = #tpu.pipeline_mode<synchronous>, transform_indices = @transform_4, window_bounds = array<i64: 2, 1, 32>}, {pipeline_mode = #tpu.pipeline_mode<synchronous>, transform_indices = @transform_5, window_bounds = array<i64: 2, 32, 64>}, {pipeline_mode = #tpu.pipeline_mode<synchronous>, transform_indices = @transform_6, window_bounds = array<i64: 2, 1, 64>}, {pipeline_mode = #tpu.pipeline_mode<synchronous>, transform_indices = @transform_7, window_bounds = array<i64: 2, 1, 32>}, {transform_indices = @transform_8, window_bounds = array<i64: 8, 8>}]} {
    %c0 = arith.constant 0 : index
    %c0_0 = arith.constant 0 : index
    %0 = vector.load %arg1[%c0, %c0_0] : memref<8x32xf32, #tpu.memory_space<vmem>>, vector<8x32xf32>
    %c0_1 = arith.constant 0 : index
    %c0_2 = arith.constant 0 : index
    %1 = vector.load %arg2[%c0_1, %c0_2] : memref<8x16xf32, #tpu.memory_space<vmem>>, vector<8x16xf32>
    %2 = arith.truncf %1 : vector<8x16xf32> to vector<8x16xbf16>
    %c0_3 = arith.constant 0 : index
    %c0_4 = arith.constant 0 : index
    %c0_5 = arith.constant 0 : index
    %3 = vector.load %arg4[%c0_3, %c0_4, %c0_5] : memref<2x16x32xbf16, #tpu.memory_space<vmem>>, vector<1x16x32xbf16>
    %4 = vector.shape_cast %3 : vector<1x16x32xbf16> to vector<16x32xbf16>
    %cst = arith.constant dense<0.000000e+00> : vector<8x32xf32>
    %5 = tpu.matmul %2, %4, %cst {dimension_numbers = #tpu.dot_dimension_numbers<[1], [0], [0], [1], [0, 0, 1, 1], [], []>} : vector<8x16xbf16>, vector<16x32xbf16>, vector<8x32xf32> -> vector<8x32xf32>
    %c0_6 = arith.constant 0 : index
    %c0_7 = arith.constant 0 : index
    %c0_8 = arith.constant 0 : index
    %6 = vector.load %arg5[%c0_6, %c0_7, %c0_8] : memref<2x1x32xf32, #tpu.memory_space<vmem>>, vector<1x1x32xf32>
    %7 = vector.shape_cast %6 : vector<1x1x32xf32> to vector<1x32xf32>
    %8 = vector.broadcast %7 : vector<1x32xf32> to vector<8x32xf32>
    %9 = arith.addf %5, %8 : vector<8x32xf32>
    %c1 = arith.constant 1 : index
    %c0_9 = arith.constant 0 : index
    %c0_10 = arith.constant 0 : index
    %10 = vector.load %arg4[%c1, %c0_9, %c0_10] : memref<2x16x32xbf16, #tpu.memory_space<vmem>>, vector<1x16x32xbf16>
    %11 = vector.shape_cast %10 : vector<1x16x32xbf16> to vector<16x32xbf16>
    %cst_11 = arith.constant dense<0.000000e+00> : vector<8x32xf32>
    %12 = tpu.matmul %2, %11, %cst_11 {dimension_numbers = #tpu.dot_dimension_numbers<[1], [0], [0], [1], [0, 0, 1, 1], [], []>} : vector<8x16xbf16>, vector<16x32xbf16>, vector<8x32xf32> -> vector<8x32xf32>
    %c1_12 = arith.constant 1 : index
    %c0_13 = arith.constant 0 : index
    %c0_14 = arith.constant 0 : index
    %13 = vector.load %arg5[%c1_12, %c0_13, %c0_14] : memref<2x1x32xf32, #tpu.memory_space<vmem>>, vector<1x1x32xf32>
    %14 = vector.shape_cast %13 : vector<1x1x32xf32> to vector<1x32xf32>
    %15 = vector.broadcast %14 : vector<1x32xf32> to vector<8x32xf32>
    %16 = arith.addf %12, %15 : vector<8x32xf32>
    %cst_15 = arith.constant 0.000000e+00 : f32
    %17 = vector.broadcast %cst_15 : f32 to vector<8x32xf32>
    %18 = arith.truncf %0 : vector<8x32xf32> to vector<8x32xbf16>
    %c0_16 = arith.constant 0 : index
    %c0_17 = arith.constant 0 : index
    %c0_18 = arith.constant 0 : index
    %19 = vector.load %arg3[%c0_16, %c0_17, %c0_18] : memref<2x32x32xbf16, #tpu.memory_space<vmem>>, vector<1x32x32xbf16>
    %20 = vector.shape_cast %19 : vector<1x32x32xbf16> to vector<32x32xbf16>
    %cst_19 = arith.constant dense<0.000000e+00> : vector<8x32xf32>
    %21 = tpu.matmul %18, %20, %cst_19 {dimension_numbers = #tpu.dot_dimension_numbers<[1], [0], [0], [1], [0, 0, 1, 1], [], []>} : vector<8x32xbf16>, vector<32x32xbf16>, vector<8x32xf32> -> vector<8x32xf32>
    %22 = arith.addf %21, %9 : vector<8x32xf32>
    %23 = math.tanh %22 : vector<8x32xf32>
    %24 = arith.truncf %23 : vector<8x32xf32> to vector<8x32xbf16>
    %c0_20 = arith.constant 0 : index
    %c0_21 = arith.constant 0 : index
    %c0_22 = arith.constant 0 : index
    %25 = vector.load %arg6[%c0_20, %c0_21, %c0_22] : memref<2x32x64xbf16, #tpu.memory_space<vmem>>, vector<1x32x64xbf16>
    %26 = vector.shape_cast %25 : vector<1x32x64xbf16> to vector<32x64xbf16>
    %cst_23 = arith.constant dense<0.000000e+00> : vector<8x64xf32>
    %27 = tpu.matmul %24, %26, %cst_23 {dimension_numbers = #tpu.dot_dimension_numbers<[1], [0], [0], [1], [0, 0, 1, 1], [], []>} : vector<8x32xbf16>, vector<32x64xbf16>, vector<8x64xf32> -> vector<8x64xf32>
    %c0_24 = arith.constant 0 : index
    %c0_25 = arith.constant 0 : index
    %c0_26 = arith.constant 0 : index
    %28 = vector.load %arg7[%c0_24, %c0_25, %c0_26] : memref<2x1x64xf32, #tpu.memory_space<vmem>>, vector<1x1x64xf32>
    %29 = vector.shape_cast %28 : vector<1x1x64xf32> to vector<1x64xf32>
    %30 = vector.broadcast %29 : vector<1x64xf32> to vector<8x64xf32>
    %31 = arith.addf %27, %30 : vector<8x64xf32>
    %c0_27 = arith.constant 0 : index
    %c0_28 = arith.constant 0 : index
    %c0_29 = arith.constant 0 : index
    %32 = vector.load %arg8[%c0_27, %c0_28, %c0_29] : memref<2x1x32xf32, #tpu.memory_space<vmem>>, vector<1x1x32xf32>
    %33 = vector.shape_cast %32 : vector<1x1x32xf32> to vector<1x32xf32>
    %34 = vector.extract_strided_slice %31 {offsets = [0, 0], sizes = [8, 32], strides = [1, 1]} : vector<8x64xf32> to vector<8x32xf32>
    %35 = math.tanh %34 : vector<8x32xf32>
    %36 = vector.broadcast %33 : vector<1x32xf32> to vector<8x32xf32>
    %37 = arith.mulf %36, %35 : vector<8x32xf32>
    %38 = vector.extract_strided_slice %31 {offsets = [0, 32], sizes = [8, 32], strides = [1, 1]} : vector<8x64xf32> to vector<8x32xf32>
    %39 = math.exp %37 : vector<8x32xf32>
    %40 = arith.mulf %0, %39 : vector<8x32xf32>
    %41 = arith.addf %40, %38 : vector<8x32xf32>
    %42 = arith.addf %17, %37 : vector<8x32xf32>
    %43 = arith.truncf %41 : vector<8x32xf32> to vector<8x32xbf16>
    %c1_30 = arith.constant 1 : index
    %c0_31 = arith.constant 0 : index
    %c0_32 = arith.constant 0 : index
    %44 = vector.load %arg3[%c1_30, %c0_31, %c0_32] : memref<2x32x32xbf16, #tpu.memory_space<vmem>>, vector<1x32x32xbf16>
    %45 = vector.shape_cast %44 : vector<1x32x32xbf16> to vector<32x32xbf16>
    %cst_33 = arith.constant dense<0.000000e+00> : vector<8x32xf32>
    %46 = tpu.matmul %43, %45, %cst_33 {dimension_numbers = #tpu.dot_dimension_numbers<[1], [0], [0], [1], [0, 0, 1, 1], [], []>} : vector<8x32xbf16>, vector<32x32xbf16>, vector<8x32xf32> -> vector<8x32xf32>
    %47 = arith.addf %46, %16 : vector<8x32xf32>
    %48 = math.tanh %47 : vector<8x32xf32>
    %49 = arith.truncf %48 : vector<8x32xf32> to vector<8x32xbf16>
    %c1_34 = arith.constant 1 : index
    %c0_35 = arith.constant 0 : index
    %c0_36 = arith.constant 0 : index
    %50 = vector.load %arg6[%c1_34, %c0_35, %c0_36] : memref<2x32x64xbf16, #tpu.memory_space<vmem>>, vector<1x32x64xbf16>
    %51 = vector.shape_cast %50 : vector<1x32x64xbf16> to vector<32x64xbf16>
    %cst_37 = arith.constant dense<0.000000e+00> : vector<8x64xf32>
    %52 = tpu.matmul %49, %51, %cst_37 {dimension_numbers = #tpu.dot_dimension_numbers<[1], [0], [0], [1], [0, 0, 1, 1], [], []>} : vector<8x32xbf16>, vector<32x64xbf16>, vector<8x64xf32> -> vector<8x64xf32>
    %c1_38 = arith.constant 1 : index
    %c0_39 = arith.constant 0 : index
    %c0_40 = arith.constant 0 : index
    %53 = vector.load %arg7[%c1_38, %c0_39, %c0_40] : memref<2x1x64xf32, #tpu.memory_space<vmem>>, vector<1x1x64xf32>
    %54 = vector.shape_cast %53 : vector<1x1x64xf32> to vector<1x64xf32>
    %55 = vector.broadcast %54 : vector<1x64xf32> to vector<8x64xf32>
    %56 = arith.addf %52, %55 : vector<8x64xf32>
    %c1_41 = arith.constant 1 : index
    %c0_42 = arith.constant 0 : index
    %c0_43 = arith.constant 0 : index
    %57 = vector.load %arg8[%c1_41, %c0_42, %c0_43] : memref<2x1x32xf32, #tpu.memory_space<vmem>>, vector<1x1x32xf32>
    %58 = vector.shape_cast %57 : vector<1x1x32xf32> to vector<1x32xf32>
    %59 = vector.extract_strided_slice %56 {offsets = [0, 0], sizes = [8, 32], strides = [1, 1]} : vector<8x64xf32> to vector<8x32xf32>
    %60 = math.tanh %59 : vector<8x32xf32>
    %61 = vector.broadcast %58 : vector<1x32xf32> to vector<8x32xf32>
    %62 = arith.mulf %61, %60 : vector<8x32xf32>
    %63 = vector.extract_strided_slice %56 {offsets = [0, 32], sizes = [8, 32], strides = [1, 1]} : vector<8x64xf32> to vector<8x32xf32>
    %64 = math.exp %62 : vector<8x32xf32>
    %65 = arith.mulf %41, %64 : vector<8x32xf32>
    %66 = arith.addf %65, %63 : vector<8x32xf32>
    %67 = arith.addf %42, %62 : vector<8x32xf32>
    %cst_44 = arith.constant dense<0.000000e+00> : vector<8xf32>
    %68 = vector.multi_reduction <add>, %67, %cst_44 [1] : vector<8x32xf32> to vector<8xf32>
    %69 = vector.shape_cast %68 : vector<8xf32> to vector<8x1xf32>
    %cst_45 = arith.constant -5.000000e-01 : f32
    %70 = vector.broadcast %cst_45 : f32 to vector<8x32xf32>
    %71 = arith.mulf %70, %66 : vector<8x32xf32>
    %72 = arith.mulf %71, %66 : vector<8x32xf32>
    %cst_46 = arith.constant 0.918938517 : f32
    %73 = vector.broadcast %cst_46 : f32 to vector<8x32xf32>
    %74 = arith.subf %72, %73 : vector<8x32xf32>
    %cst_47 = arith.constant dense<0.000000e+00> : vector<8xf32>
    %75 = vector.multi_reduction <add>, %74, %cst_47 [1] : vector<8x32xf32> to vector<8xf32>
    %76 = vector.shape_cast %75 : vector<8xf32> to vector<8x1xf32>
    %77 = arith.addf %76, %69 : vector<8x1xf32>
    %78 = tpu.iota {dimensions = array<i32: 1>} : vector<8x8xi32>
    %c0_i32 = arith.constant 0 : i32
    %79 = vector.broadcast %c0_i32 : i32 to vector<8x8xi32>
    %80 = arith.cmpi eq, %78, %79 : vector<8x8xi32>
    %c1_i32 = arith.constant 1 : i32
    %81 = vector.broadcast %c1_i32 : i32 to vector<8x8xi32>
    %82 = arith.cmpi eq, %78, %81 : vector<8x8xi32>
    %c2_i32 = arith.constant 2 : i32
    %83 = vector.broadcast %c2_i32 : i32 to vector<8x8xi32>
    %84 = arith.cmpi eq, %78, %83 : vector<8x8xi32>
    %cst_48 = arith.constant 0.000000e+00 : f32
    %85 = vector.shape_cast %69 : vector<8x1xf32> to vector<8x1xf32>
    %86 = vector.broadcast %85 : vector<8x1xf32> to vector<8x8xf32>
    %87 = vector.broadcast %cst_48 : f32 to vector<8x8xf32>
    %88 = arith.select %84, %86, %87 : vector<8x8xi1>, vector<8x8xf32>
    %89 = vector.shape_cast %76 : vector<8x1xf32> to vector<8x1xf32>
    %90 = vector.broadcast %89 : vector<8x1xf32> to vector<8x8xf32>
    %91 = arith.select %82, %90, %88 : vector<8x8xi1>, vector<8x8xf32>
    %92 = vector.shape_cast %77 : vector<8x1xf32> to vector<8x1xf32>
    %93 = vector.broadcast %92 : vector<8x1xf32> to vector<8x8xf32>
    %94 = arith.select %80, %93, %91 : vector<8x8xi1>, vector<8x8xf32>
    %c0_49 = arith.constant 0 : index
    %c0_50 = arith.constant 0 : index
    %95 = vector.load %arg9[%c0_49, %c0_50] : memref<8x8xf32, #tpu.memory_space<vmem>>, vector<8x8xf32>
    tpu.vector_store %arg9[%c0_49, %c0_50], %94 {strides = array<i32>} : memref<8x8xf32, #tpu.memory_space<vmem>>, vector<8x8xf32>,
    return
  }
  func.func @transform_0(%arg0: i32) -> (i32, i32) {
    %c0_i32 = arith.constant 0 : i32
    %c0_i32_0 = arith.constant 0 : i32
    return %arg0, %c0_i32 : i32, i32
  }
  func.func @transform_1(%arg0: i32) -> (i32, i32) {
    %c0_i32 = arith.constant 0 : i32
    %c0_i32_0 = arith.constant 0 : i32
    return %arg0, %c0_i32 : i32, i32
  }
  func.func @transform_2(%arg0: i32) -> (i32, i32, i32) {
    %c0_i32 = arith.constant 0 : i32
    %c0_i32_0 = arith.constant 0 : i32
    %c0_i32_1 = arith.constant 0 : i32
    %c0_i32_2 = arith.constant 0 : i32
    return %c0_i32, %c0_i32_0, %c0_i32_1 : i32, i32, i32
  }
  func.func @transform_3(%arg0: i32) -> (i32, i32, i32) {
    %c0_i32 = arith.constant 0 : i32
    %c0_i32_0 = arith.constant 0 : i32
    %c0_i32_1 = arith.constant 0 : i32
    %c0_i32_2 = arith.constant 0 : i32
    return %c0_i32, %c0_i32_0, %c0_i32_1 : i32, i32, i32
  }
  func.func @transform_4(%arg0: i32) -> (i32, i32, i32) {
    %c0_i32 = arith.constant 0 : i32
    %c0_i32_0 = arith.constant 0 : i32
    %c0_i32_1 = arith.constant 0 : i32
    %c0_i32_2 = arith.constant 0 : i32
    return %c0_i32, %c0_i32_0, %c0_i32_1 : i32, i32, i32
  }
  func.func @transform_5(%arg0: i32) -> (i32, i32, i32) {
    %c0_i32 = arith.constant 0 : i32
    %c0_i32_0 = arith.constant 0 : i32
    %c0_i32_1 = arith.constant 0 : i32
    %c0_i32_2 = arith.constant 0 : i32
    return %c0_i32, %c0_i32_0, %c0_i32_1 : i32, i32, i32
  }
  func.func @transform_6(%arg0: i32) -> (i32, i32, i32) {
    %c0_i32 = arith.constant 0 : i32
    %c0_i32_0 = arith.constant 0 : i32
    %c0_i32_1 = arith.constant 0 : i32
    %c0_i32_2 = arith.constant 0 : i32
    return %c0_i32, %c0_i32_0, %c0_i32_1 : i32, i32, i32
  }
  func.func @transform_7(%arg0: i32) -> (i32, i32, i32) {
    %c0_i32 = arith.constant 0 : i32
    %c0_i32_0 = arith.constant 0 : i32
    %c0_i32_1 = arith.constant 0 : i32
    %c0_i32_2 = arith.constant 0 : i32
    return %c0_i32, %c0_i32_0, %c0_i32_1 : i32, i32, i32
  }
  func.func @transform_8(%arg0: i32) -> (i32, i32) {
    %c0_i32 = arith.constant 0 : i32
    %c0_i32_0 = arith.constant 0 : i32
    return %arg0, %c0_i32 : i32, i32
  }
}

</mosaic_0001>

<bundles_post_ra>
// kernel: flow_log_prob.1
= control target key start
LH: loop header
LB: loop body
LE: loop exit
PB: predicated region body
PF: predicated region fallthrough
CT: control target
= control target key end

     0   :  { %13 = vsyncpa [#allocation3], 0  ;;  %s678_s0 = inlined_call_operand.hbm [shape: f32[8,32], index: 0, kind: input, shape index: {}]   ;;  %s679_s1 = inlined_call_operand.hbm [shape: f32[8,16], index: 1, kind: input, shape index: {}]   ;;  %s680_s2 = inlined_call_operand.hbm [shape: bf16[2,32,32], index: 2, kind: input, shape index: {}]   ;;  %s681_s3 = inlined_call_operand.hbm [shape: bf16[2,16,32], index: 3, kind: input, shape index: {}]   ;;  %s682_s4 = inlined_call_operand.vmem [shape: f32[2,1,32], index: 4, kind: input, shape index: {}]   ;;  %s683_s5 = inlined_call_operand.hbm [shape: bf16[2,32,64], index: 5, kind: input, shape index: {}]   ;;  %s684_s6 = inlined_call_operand.vmem [shape: f32[2,1,64], index: 6, kind: input, shape index: {}]   ;;  %s685_s7 = inlined_call_operand.vmem [shape: f32[2,1,32], index: 7, kind: input, shape index: {}]   ;;  %s686_s8 = inlined_call_operand.vmem [shape: f32[8,8], index: 8, kind: output, shape index: {}]  }
   0x1   :  { %14 = vsyncpa [#allocation5], 0  ;;  %s32_s29 = sshll.u32 %s679_s1, 4  ;;  %s33_s29 = int_to_ptr.hbm [resolvable:$true] %s32_s29 }
   0x2   :  { %15 = vsyncpa [#allocation8], 0  ;;  %s579_s30 = smov [#allocation4]   ;;  %s55_s12 = sshll.u32 %s681_s3, 4  ;;  %s56_s12 = int_to_ptr.hbm [resolvable:$true] %s55_s12 }
   0x3   :  { %s34_s9 = sshll.u32 %s579_s30, 4  ;;  %s580_s13 = smov [#allocation7]   ;;  %s35_s9 = int_to_ptr.vmem [resolvable:$true] %s34_s9 }
   0x4   :  { %37 = dma.hbm_to_vmem [thread:$0]  %s33_s29, 128, %s35_s9, [#allocation5]  }
   0x5   :  { %s57_s14 = sshll.u32 %s580_s13, 4  ;;  %s21_s17 = sshll.u32 %s678_s0, 4  ;;  %s58_s14 = int_to_ptr.vmem [resolvable:$true] %s57_s14  ;;  %s22_s17 = int_to_ptr.hbm [resolvable:$true] %s21_s17 }
   0x6   :  { %s581_s1 = smov 64   ;;  %s582_s18 = smov 4  }
   0x7   :  { %63 = dma.hbm_to_vmem [thread:$0]  %s56_s12, 256, %s58_s14, [#allocation8], %s581_s1, %s581_s1, %s582_s18  }
   0x8   :  { %s42_s21 = sshll.u32 %s680_s2, 4  ;;  %s583_s22 = smov [#allocation2]   ;;  %s43_s21 = int_to_ptr.hbm [resolvable:$true] %s42_s21 }
   0x9   :  { %s23_s23 = sshll.u32 %s583_s22, 4  ;;  %s584_s3 = smov [#allocation6]   ;;  %s24_s23 = int_to_ptr.vmem [resolvable:$true] %s23_s23 }
   0xa   :  { %26 = dma.hbm_to_vmem [thread:$0]  %s22_s17, 128, %s24_s23, [#allocation3]  }
   0xb   :  { %s44_s24 = sshll.u32 %s584_s3, 4  ;;  %s70_s0 = sshll.u32 %s683_s5, 4  ;;  %s45_s24 = int_to_ptr.vmem [resolvable:$true] %s44_s24  ;;  %s71_s0 = int_to_ptr.hbm [resolvable:$true] %s70_s0 }
   0xc   :  { %50 = dma.hbm_to_vmem [thread:$0]  %s43_s21, 512, %s45_s24, [#allocation5], %s581_s1, %s581_s1, %s582_s18  }
   0xd   :  { %s585_s27 = smov [#allocation9]  }
   0xe   :  { %s72_s28 = sshll.u32 %s585_s27, 4  ;;  %s73_s28 = int_to_ptr.vmem [resolvable:$true] %s72_s28 }
   0xf   :  { %78 = dma.hbm_to_vmem [thread:$0]  %s71_s0, 512, %s73_s28, [#allocation8], %s581_s1, %s581_s1, %s582_s18  }
  0x10   :  { %573 = dma.done.wait [#allocation3], 128  }
  0x11   :  { %574 = vsyncadd [#allocation3], 4294967168 }
  0x12   :  { %575 = dma.done.wait [#allocation5], 640  }
  0x13   :  { %576 = vsyncadd [#allocation5], 4294966656 }
  0x14   :  { %577 = dma.done.wait [#allocation8], 768  }
  0x15   :  { %578 = vsyncadd [#allocation8], 4294966528  ;;  %v417_v0 = vld [vmem:[#allocation7] sm:$0xff]  ;;  %v420_v1 = vld [vmem:[#allocation6 + $0x8] sm:$0xff]  ;;  %vm119_vm0 = vcmask 130048   ;;  %vm180_vm1 = vcmask 261120   ;;  %v350_v63 = vlaneseq }
  0x16   :  { %v105_v2 = vld [vmem:[#allocation4] sm:$0xff]  ;;  %v419_v4 = vld [vmem:[#allocation6] sm:$0xff]  ;;  %130 = vmatpush.bf16.msra.mxu0 %v417_v0  ;;  %190 = vmatpush.bf16.msra.mxu2 %v420_v1  ;;  %v104_v5 = vld [vmem:[#allocation2] sm:$0xff]  ;;  %s586_s9 = smov 96   ;;  %vm358_vm5 = vcmask 64512  }
  0x17   :  { %v106_v3 = vpack.c.bf16 %v105_v2, %v105_v2  ;;  %v163_v6 = vpack.c.bf16 %v104_v5, %v104_v5  ;;  %v422_v7 = vld [vmem:[#allocation9 + $0x8] sm:$0xff]  ;;  %v421_v8 = vld [vmem:[#allocation9] sm:$0xff]  ;;  %v418_v19 = vld [vmem:[#allocation7 + $0x8] sm:$0xff]  ;;  %v351_v1 = vand.u32 127, %v350_v63 }
  0x18   :  { %228 = vmatpush.bf16.msra.mxu3 %v422_v7  ;;  %v435_v10 = vld [vmem:[%s682_s4] ss:$0 sm:$0xff]  ;;  %v424_v18 = vld [vmem:[#allocation6 + $0x18] sm:$0xff]  ;;  %157 = vmatpush.bf16.msra.mxu1 %v418_v19  ;;  %v426_v25 = vld [vmem:[#allocation9 + $0x18] sm:$0xff] }
  0x19   :  { %371 = vmatmul.msk.bf16.vlgmr.msra.gmra.mxu0 %vm119_vm0, %v106_v3  ;;  %v423_v20 = vld [vmem:[#allocation6 + $0x10] sm:$0xff]  ;;  %v425_v37 = vld [vmem:[#allocation9 + $0x10] sm:$0xff]  ;;  %vm354_vm2 = vcmp.eq.s32.totalorder %v351_v1, 2  ;;  %vm353_vm3 = vcmp.eq.s32.totalorder %v351_v1, 1  ;;  %vm352_vm4 = vcmp.eq.s32.totalorder %v351_v1, 0 }
  0x1a   :  { %191 = vmatpush.bf16.msra.mxu2 %v419_v4  ;;  %277 = vmatpush.bf16.msrb.mxu0 %v424_v18  ;;  %v436_v21 = vld [vmem:[%s684_s6] ss:$0 sm:$0xff]  ;;  %v438_v38 = vld [vmem:[%s682_s4 + $0x1] ss:$0 sm:$0xff] }
  0x1b   :  { %377 = vmatmul.msk.bf16.vlgmr.msra.gmra.mxu1 %vm119_vm0, %v106_v3  ;;  %v437_v26 = vld [vmem:[%s685_s7] ss:$0 sm:$0xff]  ;;  %v439_v45 = vld [vmem:[%s684_s6 + $0x1] ss:$0 sm:$0xff] }
  0x1c   :  { %229 = vmatpush.bf16.msra.mxu3 %v421_v8  ;;  %317 = vmatpush.bf16.msrb.mxu1 %v426_v25  ;;  %v440_v48 = vld [vmem:[%s685_s7 + $0x1] ss:$0 sm:$0xff] }
  0x1d   :  { %386 = vmatmul.msk.bf16.vlgmr.msra.gmra.mxu2 %vm180_vm1, %v163_v6 }
  0x1e   :  { %278 = vmatpush.bf16.msrb.mxu0 %v423_v20 }
  0x20   :  { %318 = vmatpush.bf16.msrb.mxu1 %v425_v37 }
  0x96   :  { %v132_v9 = vpop.f32.mrf.mxu0 }
  0x97   :  { %v133_v11 = vadd.f32 %v435_v10, %v132_v9 }
  0x98   :  { %v159_v30 = vpop.f32.mrf.mxu1 }
  0x99   :  { %v160_v39 = vadd.f32 %v438_v38, %v159_v30 }
  0x9e   :  { %v134_v12 = vpop.f32.mrf.mxu0 }
  0xa0   :  { %v193_v13 = vpop.f32.mrf.mxu2  ;;  %v161_v33 = vpop.f32.mrf.mxu1 }
  0xa1   :  { %v194_v14 = vadd.f32 %v193_v13, %v133_v11 }
  0xa3   :  { %441 = vtanh.f32 %v194_v14 }
  0xa8   :  { %v195_v15 = vpop.f32.mrf.mxu2 }
  0xa9   :  { %v442_v16 = vpop.eup %441 }
  0xaa   :  { %v198_v17 = vpack.c.bf16 %v442_v16, %v442_v16 }
  0xac   :  { %395 = vmatmul.msk.bf16.vlgmr.msra.gmra.mxu3 %vm180_vm1, %v198_v17 }
 0x12f   :  { %v231_v22 = vpop.f32.mrf.mxu3 }
 0x130   :  { %v232_v23 = vadd.f32 %v436_v21, %v231_v22 }
 0x132   :  { %245 = vrot.lane.b32.xlu0 %v232_v23, %s586_s9  ;;  %443 = vtanh.f32 %v232_v23 }
 0x137   :  { %v233_v24 = vpop.f32.mrf.mxu3 }
 0x138   :  { %v444_v27 = vpop.eup %443 }
 0x139   :  { %v240_v28 = vmul.f32 %v444_v27, %v437_v26 }
 0x13b   :  { %v241_v29 = vmul.f32 1.442695, %v240_v28 }
 0x13d   :  { %445 = vpow2.f32 %v241_v29 }
 0x143   :  { %v446_v31 = vpop.eup %445 }
 0x144   :  { %v243_v32 = vmul.f32 %v446_v31, %v104_v5 }
 0x1a4   :  { %v246_v34 = vpop.permute.xlu0 %245 }
 0x1a5   :  { %v248_v35 = vadd.f32 %v246_v34, %v243_v32 }
 0x1a7   :  { %v250_v36 = vpack.c.bf16 %v248_v35, %v248_v35 }
 0x1a9   :  { %404 = vmatmul.msk.bf16.vlgmr.msrb.gmra.mxu0 %vm180_vm1, %v250_v36 }
 0x226   :  { %v280_v40 = vpop.f32.mrf.mxu0 }
 0x227   :  { %v281_v41 = vadd.f32 %v280_v40, %v160_v39 }
 0x229   :  { %447 = vtanh.f32 %v281_v41 }
 0x22e   :  { %v282_v42 = vpop.f32.mrf.mxu0 }
 0x22f   :  { %v448_v43 = vpop.eup %447 }
 0x230   :  { %v285_v44 = vpack.c.bf16 %v448_v43, %v448_v43 }
 0x232   :  { %414 = vmatmul.msk.bf16.vlgmr.msrb.gmra.mxu1 %vm180_vm1, %v285_v44 }
 0x2af   :  { %v320_v46 = vpop.f32.mrf.mxu1 }
 0x2b0   :  { %v321_v47 = vadd.f32 %v439_v45, %v320_v46 }
 0x2b2   :  { %449 = vtanh.f32 %v321_v47  ;;  %335 = vrot.lane.b32.xlu0 %v321_v47, %s586_s9 }
 0x2b7   :  { %v322_v49 = vpop.f32.mrf.mxu1 }
 0x2b8   :  { %v450_v50 = vpop.eup %449 }
 0x2b9   :  { %v330_v51 = vmul.f32 %v450_v50, %v440_v48 }
 0x2bb   :  { %v339_v52 = vadd.f32 %v330_v51, %v240_v28  ;;  %v331_v54 = vmul.f32 1.442695, %v330_v51 }
 0x2bd   :  { %v340_v53 = vsel %vm180_vm1, %v339_v52, 0.0  ;;  %451 = vpow2.f32 %v331_v54 }
 0x2be   :  { %341 = vadd.xlane.f32.xlu1 %v340_v53 }
 0x2c3   :  { %v452_v55 = vpop.eup %451 }
 0x2c4   :  { %v333_v56 = vmul.f32 %v452_v55, %v248_v35 }
 0x324   :  { %v336_v57 = vpop.permute.xlu0 %335 }
 0x325   :  { %v338_v58 = vadd.f32 %v336_v57, %v333_v56 }
 0x327   :  { %v343_v59 = vmul.f32 -0.5, %v338_v58 }
 0x329   :  { %v344_v60 = vmul.f32 %v343_v59, %v338_v58 }
 0x32b   :  { %v416_v61 = vadd.f32 -0.9189385, %v344_v60 }
 0x32d   :  { %v346_v62 = vsel %vm180_vm1, %v416_v61, 0.0 }
 0x32e   :  { %347 = vadd.xlane.f32.xlu1 %v346_v62 }
 0x331   :  { %v342_v0 = vpop.xlane.xlu1 %341 }
 0x332   :  { %v355_v2 = vsel %vm354_vm2, %v342_v0, 0.0 }
 0x3a1   :  { %v348_v3 = vpop.xlane.xlu1 %347 }
 0x3a2   :  { %v349_v4 = vadd.f32 %v348_v3, %v342_v0  ;;  %v356_v5 = vsel %vm353_vm3, %v348_v3, %v355_v2 }
 0x3a4   :  { %v357_v6 = vsel %vm352_vm4, %v349_v4, %v356_v5 }
 0x3a5   :  { %359 = vst.msk [vmem:[%s686_s8] sm:$0xff] %vm358_vm5, %v357_v6 }
 0x3a6   :  { %364 = vsyncpa [#allocation3], 1 }
 0x3a7   :  { %365 = vsyncpa [#allocation5], 1 }
 0x3a8   :  { %366 = vsyncpa [#allocation8], 1 }

</bundles_post_ra>
